<compile_context>
chip_gen: v7x
topology: tpu7x:2x2x1
jax: 0.10.0
libtpu: 0.0.40
codegen_flags: <defaults>
</compile_context>

<pallas_src>
import jax
import jax.numpy as jnp
from jax.experimental import pallas as pl
from jax.experimental.pallas import tpu as pltpu

# ---- synthetic, deterministic config (module config object not available) ----
BATCH = 2
MHC_LEN = 12
PEP_LEN = 4
N = MHC_LEN + PEP_LEN               # 16 total residues
D = 32                              # embedder dim == rel_pos_dim
MAX_REL_DIST = 32
NO_BINS = 16                        # distogram bins
VOCAB = 21                          # aatype vocab

ENC_LANES = PEP_LEN * D             # 128 : packed pep×pep pair rows / encoder output
DIST_K = 2 * PEP_LEN * D            # 256 : packed mhc×pep pair rows (chunks 2j, 2j+1)
DIST_LANES = 2 * PEP_LEN * NO_BINS  # 128 : packed distogram output lanes

ENC_ROWS = BATCH * PEP_LEN          # 8  : one full (8,128) f32 vreg
DIST_ROWS = BATCH * MHC_LEN         # 24 : three full sublane tiles


# ---------------- fused Pallas kernel ----------------

def mpsp_fused_kernel(enc_pair_ref, dist_pair_ref,
                      enc_w_ref, enc_b_ref, dist_w_ref, dist_b_ref,
                      pair_out_ref, dist_out_ref):
    # Encoder stand-in (pointwise Linear + ReLU) on the pep×pep pair block.
    # enc_pair row (b*PEP_LEN + i), lanes j*D:(j+1)*D hold pair(12+i, 12+j);
    # enc_w is block-diagonal kron(I_4, W) so one (8,128)x(128,128) MXU dot does
    # all 4 column blocks at once and the output stays lane-dense.
    y = jnp.dot(enc_pair_ref[...], enc_w_ref[...],
                preferred_element_type=jnp.float32)
    pair_out_ref[...] = jnp.maximum(y + enc_b_ref[...], 0.0)

    # Distogram Linear on the mhc×pep / (pep×mhc)ᵀ pair blocks.
    # dist_pair row (b*MHC_LEN + i): chunk 2j holds pair(i, 12+j), chunk 2j+1
    # holds pair(12+j, i); block-diagonal kron(I_8, Wd) maps chunk k -> 16 output
    # lanes, directly producing torch.cat((d1, d2.transpose(1,2)), dim=3) packed
    # as lane-dense (24,128).
    z = jnp.dot(dist_pair_ref[...], dist_w_ref[...],
                preferred_element_type=jnp.float32)
    dist_out_ref[...] = z + dist_b_ref[...]


def mpsp_fused(enc_pair, dist_pair, enc_w_bd, enc_b_bd, dist_w_bd, dist_b_bd):
    rows_enc = enc_pair.shape[0]     # B * PEP_LEN
    rows_dist = dist_pair.shape[0]   # B * MHC_LEN
    return pl.pallas_call(
        mpsp_fused_kernel,
        out_shape=(
            jax.ShapeDtypeStruct((rows_enc, ENC_LANES), jnp.float32),
            jax.ShapeDtypeStruct((rows_dist, DIST_LANES), jnp.float32),
        ),
        grid=(1,),
        in_specs=[
            pl.BlockSpec((rows_enc, ENC_LANES), lambda i: (0, 0)),
            pl.BlockSpec((rows_dist, DIST_K), lambda i: (0, 0)),
            pl.BlockSpec((ENC_LANES, ENC_LANES), lambda i: (0, 0)),
            pl.BlockSpec((1, ENC_LANES), lambda i: (0, 0)),
            pl.BlockSpec((DIST_K, DIST_LANES), lambda i: (0, 0)),
            pl.BlockSpec((1, DIST_LANES), lambda i: (0, 0)),
        ],
        out_specs=(
            pl.BlockSpec((rows_enc, ENC_LANES), lambda i: (0, 0)),
            pl.BlockSpec((rows_dist, DIST_LANES), lambda i: (0, 0)),
        ),
        compiler_params=pltpu.CompilerParams(
            dimension_semantics=("arbitrary",),           # single step; no megacore split at B=2
            vmem_limit_bytes=4 * 1024 * 1024,             # ~0.5 MiB live; far under every chip
            # Let XLA fuse the pair-packing producers into the first two operands.
            allow_input_fusion=[True, True, False, False, False, False],
        ),
    )(enc_pair, dist_pair, enc_w_bd, enc_b_bd, dist_w_bd, dist_b_bd)


# ---------------- one-time parameter packing (hoisted off the forward path) ----------------

def prepare_params(params):
    """Block-diagonal weight / bias packing done once, not per forward call."""
    f32 = jnp.float32
    return {
        "embedder_table": params["embedder_table"].astype(f32),
        "pos_emb_table": params["pos_emb_table"].astype(f32),
        # (128,128): kron(I_4, enc_w) — one 2-D MXU dot handles all pep columns.
        "enc_w_bd": jnp.kron(jnp.eye(PEP_LEN, dtype=f32), params["enc_w"].astype(f32)),
        "enc_b_bd": jnp.tile(params["enc_b"].astype(f32), PEP_LEN).reshape(1, ENC_LANES),
        # (256,128): kron(I_8, dist_w) — one dot handles both mhc×pep directions.
        "dist_w_bd": jnp.kron(jnp.eye(2 * PEP_LEN, dtype=f32), params["dist_w"].astype(f32)),
        "dist_b_bd": jnp.tile(params["dist_b"].astype(f32), 2 * PEP_LEN).reshape(1, DIST_LANES),
    }


# ---------------- forward pass ----------------

def mpsp_forward(prepped, x_aatype, p_aatype):
    # TODO(synk): p_aatype is only consumed by the (omitted) structure-module Decoder.
    del p_aatype
    f32 = jnp.float32

    # Embedding lookups (gathers) — JAX glue.
    x_emb = jnp.take(prepped["embedder_table"], x_aatype, axis=0)        # (B, N, D)
    B = x_emb.shape[0]

    # Relative-position embedding indices + gather (glue).
    mp_index = jnp.arange(N)
    rel_pos = mp_index[:, None] - mp_index[None, :]
    rel_pos = jnp.clip(rel_pos, -MAX_REL_DIST, MAX_REL_DIST) + MAX_REL_DIST
    rel_emb = jnp.take(prepped["pos_emb_table"], rel_pos, axis=0).astype(f32)  # (N, N, D)

    e_mhc = x_emb[:, :MHC_LEN, :].astype(f32)                            # (B, 12, 32)
    e_pep = x_emb[:, MHC_LEN:, :].astype(f32)                            # (B, 4, 32)

    # ---- lane/sublane-dense packing of the pre-summed pair blocks ----
    # (pure layout + elementwise adds; fused into the pallas_call operands)
    # Encoder (pep×pep): row b*PEP_LEN+i, lanes j*D.. hold pair(12+i, 12+j).
    enc_pair = (e_pep[:, :, None, :] + e_pep[:, None, :, :]
                + rel_emb[None, MHC_LEN:, MHC_LEN:, :]).reshape(B * PEP_LEN, ENC_LANES)

    # Distogram (mhc×pep both directions): row b*MHC_LEN+i,
    #   chunk 2j   = pair(i, 12+j)   -> d1 bins,
    #   chunk 2j+1 = pair(12+j, i)   -> d2.transpose(1,2) bins.
    pair_ij = e_mhc[:, :, None, :] + e_pep[:, None, :, :] + rel_emb[None, :MHC_LEN, MHC_LEN:, :]
    pair_ji = (e_pep[:, None, :, :] + e_mhc[:, :, None, :]
               + jnp.transpose(rel_emb[MHC_LEN:, :MHC_LEN, :], (1, 0, 2))[None])
    dist_pair = jnp.stack([pair_ij, pair_ji], axis=3).reshape(B * MHC_LEN, DIST_K)

    # ---- single fused kernel: encoder Linear+ReLU and distogram Linear ----
    # TODO(synk): real Encoder (pair attention / triangle-update stack) source not
    # provided; a single pointwise Linear+ReLU over the channel dim stands in.
    pair_dense, dist_dense = mpsp_fused(
        enc_pair, dist_pair,
        prepped["enc_w_bd"], prepped["enc_b_bd"],
        prepped["dist_w_bd"], prepped["dist_b_bd"])

    p_outputs = {}
    mp_outputs = {}
    p_outputs["single"] = e_pep                                          # (B, pep, D)
    # NOTE: x_en is only computed on the pep×pep block because that is the only part
    # consumed downstream here (the Decoder that consumes the full x_en is omitted).
    p_outputs["pair"] = pair_dense.reshape(B, PEP_LEN, PEP_LEN, D)       # (B, pep, pep, D)

    # TODO(synk): Decoder (structure module), atom14_to_atom37, AuxiliaryHeads are
    # external modules whose source is not given; their outputs are omitted here.

    # Distogram logits already packed as torch.cat((mp_dist_1, mp_dist_2.T), dim=3).
    mp_outputs["distogram_logits"] = dist_dense.reshape(B, MHC_LEN, PEP_LEN, 2 * NO_BINS)
    return p_outputs, mp_outputs


def init_params(key):
    ks = jax.random.split(key, 4)
    return {
        "embedder_table": 0.02 * jax.random.normal(ks[0], (VOCAB, D), jnp.float32),
        "pos_emb_table": 0.02 * jax.random.normal(ks[1], (2 * MAX_REL_DIST + 1, D), jnp.float32),
        "enc_w": 0.1 * jax.random.normal(ks[2], (D, D), jnp.float32),
        "enc_b": jnp.zeros((D,), jnp.float32),
        "dist_w": 0.1 * jax.random.normal(ks[3], (D, NO_BINS), jnp.float32),
        "dist_b": jnp.zeros((NO_BINS,), jnp.float32),
    }


def reference_forward(params, x_aatype):
    """Pure-JAX reference of the same hot paths (HIGHEST precision)."""
    hp = jax.lax.Precision.HIGHEST
    x_emb = jnp.take(params["embedder_table"], x_aatype, axis=0)
    mp_index = jnp.arange(N)
    rel_pos = jnp.clip(mp_index[:, None] - mp_index[None, :],
                       -MAX_REL_DIST, MAX_REL_DIST) + MAX_REL_DIST
    rel_emb = jnp.take(params["pos_emb_table"], rel_pos, axis=0)
    pair = x_emb[:, :, None, :] + x_emb[:, None, :, :] + rel_emb[None]
    x_en = jnp.maximum(
        jnp.einsum("bijd,de->bije", pair, params["enc_w"], precision=hp) + params["enc_b"], 0.0)
    logits = jnp.einsum("bijd,dn->bijn", pair, params["dist_w"], precision=hp) + params["dist_b"]
    p_pair = x_en[:, MHC_LEN:, MHC_LEN:, :]
    d1 = logits[:, :MHC_LEN, MHC_LEN:, :]
    d2 = jnp.transpose(logits[:, MHC_LEN:, :MHC_LEN, :], (0, 2, 1, 3))
    return p_pair, jnp.concatenate([d1, d2], axis=-1)


if __name__ == "__main__":
    key = jax.random.PRNGKey(0)
    kp, k1 = jax.random.split(key, 2)
    raw_params = init_params(kp)
    params = prepare_params(raw_params)          # one-time block-diagonal weight packing
    jax.block_until_ready(params["dist_w_bd"])

    x_aatype = jax.random.randint(k1, (BATCH, N), 0, VOCAB, dtype=jnp.int32)   # full complex
    p_aatype = x_aatype[:, MHC_LEN:]                                            # peptide part

    fwd = jax.jit(mpsp_forward)
    p_out, mp_out = fwd(params, x_aatype, p_aatype)
    jax.block_until_ready(mp_out["distogram_logits"])

    assert p_out["single"].shape == (BATCH, PEP_LEN, D)
    assert p_out["pair"].shape == (BATCH, PEP_LEN, PEP_LEN, D)
    assert mp_out["distogram_logits"].shape == (BATCH, MHC_LEN, PEP_LEN, 2 * NO_BINS)

    ref_pair, ref_dist = reference_forward(raw_params, x_aatype)
    assert jnp.allclose(p_out["pair"], ref_pair, atol=1e-4, rtol=1e-4), \
        float(jnp.max(jnp.abs(p_out["pair"] - ref_pair)))
    assert jnp.allclose(mp_out["distogram_logits"], ref_dist, atol=1e-4, rtol=1e-4), \
        float(jnp.max(jnp.abs(mp_out["distogram_logits"] - ref_dist)))

    print("KERNEL_OK")
</pallas_src>

<mosaic_0001>
module attributes {stable_mosaic.version = 11 : i64} {
  func.func @mpsp_fused_kernel(%arg0: i32, %arg1: memref<8x128xf32, #tpu.memory_space<vmem>>, %arg2: memref<24x256xf32, #tpu.memory_space<vmem>>, %arg3: memref<128x128xf32, #tpu.memory_space<vmem>>, %arg4: memref<1x128xf32, #tpu.memory_space<vmem>>, %arg5: memref<256x128xf32, #tpu.memory_space<vmem>>, %arg6: memref<1x128xf32, #tpu.memory_space<vmem>>, %arg7: memref<8x128xf32, #tpu.memory_space<vmem>>, %arg8: memref<24x128xf32, #tpu.memory_space<vmem>>) attributes {dimension_semantics = [#tpu.dimension_semantics<arbitrary>], iteration_bounds = array<i64: 1>, scalar_prefetch = 0 : i64, scratch_operands = 0 : i64, tpu.core_type = #tpu.core_type<tc>, window_params = [{pipeline_mode = #tpu.pipeline_mode<synchronous>, transform_indices = @transform_0, window_bounds = array<i64: 8, 128>}, {pipeline_mode = #tpu.pipeline_mode<synchronous>, transform_indices = @transform_1, window_bounds = array<i64: 24, 256>}, {pipeline_mode = #tpu.pipeline_mode<synchronous>, transform_indices = @transform_2, window_bounds = array<i64: 128, 128>}, {pipeline_mode = #tpu.pipeline_mode<synchronous>, transform_indices = @transform_3, window_bounds = array<i64: 1, 128>}, {pipeline_mode = #tpu.pipeline_mode<synchronous>, transform_indices = @transform_4, window_bounds = array<i64: 256, 128>}, {pipeline_mode = #tpu.pipeline_mode<synchronous>, transform_indices = @transform_5, window_bounds = array<i64: 1, 128>}, {pipeline_mode = #tpu.pipeline_mode<synchronous>, transform_indices = @transform_6, window_bounds = array<i64: 8, 128>}, {pipeline_mode = #tpu.pipeline_mode<synchronous>, transform_indices = @transform_7, window_bounds = array<i64: 24, 128>}]} {
    %c0 = arith.constant 0 : index
    %c0_0 = arith.constant 0 : index
    %0 = vector.load %arg1[%c0, %c0_0] : memref<8x128xf32, #tpu.memory_space<vmem>>, vector<8x128xf32>
    %c0_1 = arith.constant 0 : index
    %c0_2 = arith.constant 0 : index
    %1 = vector.load %arg3[%c0_1, %c0_2] : memref<128x128xf32, #tpu.memory_space<vmem>>, vector<128x128xf32>
    %cst = arith.constant dense<0.000000e+00> : vector<8x128xf32>
    %2 = tpu.matmul %0, %1, %cst {dimension_numbers = #tpu.dot_dimension_numbers<[1], [0], [0], [1], [0, 0, 1, 1], [], []>} : vector<8x128xf32>, vector<128x128xf32>, vector<8x128xf32> -> vector<8x128xf32>
    %c0_3 = arith.constant 0 : index
    %c0_4 = arith.constant 0 : index
    %3 = vector.load %arg4[%c0_3, %c0_4] : memref<1x128xf32, #tpu.memory_space<vmem>>, vector<1x128xf32>
    %4 = vector.broadcast %3 : vector<1x128xf32> to vector<8x128xf32>
    %5 = arith.addf %2, %4 : vector<8x128xf32>
    %cst_5 = arith.constant 0.000000e+00 : f32
    %6 = vector.broadcast %cst_5 : f32 to vector<8x128xf32>
    %7 = arith.maximumf %5, %6 : vector<8x128xf32>
    %c0_6 = arith.constant 0 : index
    %c0_7 = arith.constant 0 : index
    %8 = vector.load %arg7[%c0_6, %c0_7] : memref<8x128xf32, #tpu.memory_space<vmem>>, vector<8x128xf32>
    tpu.vector_store %arg7[%c0_6, %c0_7], %7 {strides = array<i32>} : memref<8x128xf32, #tpu.memory_space<vmem>>, vector<8x128xf32>,
    %c0_8 = arith.constant 0 : index
    %c0_9 = arith.constant 0 : index
    %9 = vector.load %arg2[%c0_8, %c0_9] : memref<24x256xf32, #tpu.memory_space<vmem>>, vector<24x256xf32>
    %c0_10 = arith.constant 0 : index
    %c0_11 = arith.constant 0 : index
    %10 = vector.load %arg5[%c0_10, %c0_11] : memref<256x128xf32, #tpu.memory_space<vmem>>, vector<256x128xf32>
    %cst_12 = arith.constant dense<0.000000e+00> : vector<24x128xf32>
    %11 = tpu.matmul %9, %10, %cst_12 {dimension_numbers = #tpu.dot_dimension_numbers<[1], [0], [0], [1], [0, 0, 1, 1], [], []>} : vector<24x256xf32>, vector<256x128xf32>, vector<24x128xf32> -> vector<24x128xf32>
    %c0_13 = arith.constant 0 : index
    %c0_14 = arith.constant 0 : index
    %12 = vector.load %arg6[%c0_13, %c0_14] : memref<1x128xf32, #tpu.memory_space<vmem>>, vector<1x128xf32>
    %13 = vector.broadcast %12 : vector<1x128xf32> to vector<24x128xf32>
    %14 = arith.addf %11, %13 : vector<24x128xf32>
    %c0_15 = arith.constant 0 : index
    %c0_16 = arith.constant 0 : index
    %15 = vector.load %arg8[%c0_15, %c0_16] : memref<24x128xf32, #tpu.memory_space<vmem>>, vector<24x128xf32>
    tpu.vector_store %arg8[%c0_15, %c0_16], %14 {strides = array<i32>} : memref<24x128xf32, #tpu.memory_space<vmem>>, vector<24x128xf32>,
    return
  }
  func.func @transform_0(%arg0: i32) -> (i32, i32) {
    %c0_i32 = arith.constant 0 : i32
    %c0_i32_0 = arith.constant 0 : i32
    %c0_i32_1 = arith.constant 0 : i32
    return %c0_i32, %c0_i32_0 : i32, i32
  }
  func.func @transform_1(%arg0: i32) -> (i32, i32) {
    %c0_i32 = arith.constant 0 : i32
    %c0_i32_0 = arith.constant 0 : i32
    %c0_i32_1 = arith.constant 0 : i32
    return %c0_i32, %c0_i32_0 : i32, i32
  }
  func.func @transform_2(%arg0: i32) -> (i32, i32) {
    %c0_i32 = arith.constant 0 : i32
    %c0_i32_0 = arith.constant 0 : i32
    %c0_i32_1 = arith.constant 0 : i32
    return %c0_i32, %c0_i32_0 : i32, i32
  }
  func.func @transform_3(%arg0: i32) -> (i32, i32) {
    %c0_i32 = arith.constant 0 : i32
    %c0_i32_0 = arith.constant 0 : i32
    %c0_i32_1 = arith.constant 0 : i32
    return %c0_i32, %c0_i32_0 : i32, i32
  }
  func.func @transform_4(%arg0: i32) -> (i32, i32) {
    %c0_i32 = arith.constant 0 : i32
    %c0_i32_0 = arith.constant 0 : i32
    %c0_i32_1 = arith.constant 0 : i32
    return %c0_i32, %c0_i32_0 : i32, i32
  }
  func.func @transform_5(%arg0: i32) -> (i32, i32) {
    %c0_i32 = arith.constant 0 : i32
    %c0_i32_0 = arith.constant 0 : i32
    %c0_i32_1 = arith.constant 0 : i32
    return %c0_i32, %c0_i32_0 : i32, i32
  }
  func.func @transform_6(%arg0: i32) -> (i32, i32) {
    %c0_i32 = arith.constant 0 : i32
    %c0_i32_0 = arith.constant 0 : i32
    %c0_i32_1 = arith.constant 0 : i32
    return %c0_i32, %c0_i32_0 : i32, i32
  }
  func.func @transform_7(%arg0: i32) -> (i32, i32) {
    %c0_i32 = arith.constant 0 : i32
    %c0_i32_0 = arith.constant 0 : i32
    %c0_i32_1 = arith.constant 0 : i32
    return %c0_i32, %c0_i32_0 : i32, i32
  }
}

</mosaic_0001>

<bundles_post_ra>
// kernel: mpsp_forward.1
= control target key start
LH: loop header
LB: loop body
LE: loop exit
PB: predicated region body
PF: predicated region fallthrough
CT: control target
= control target key end

     0   :  { %v411_v3 = vmov 0.0|0.0   ;;  %vm412_vm0 = vmmov 0   ;;  %v413_v4 = vmov 0.0   ;;  %s645_s4 = inlined_call_operand.vmem [shape: f32[256,128], index: 4, kind: input, shape index: {}]   ;;  %s646_s2 = inlined_call_operand.vmem [shape: f32[128,128], index: 2, kind: input, shape index: {}]   ;;  %s647_s1 = inlined_call_operand.vmem [shape: f32[24,256], index: 1, kind: input, shape index: {}]   ;;  %s648_s0 = inlined_call_operand.vmem [shape: f32[8,128], index: 0, kind: input, shape index: {}]   ;;  %s649_s3 = inlined_call_operand.vmem [shape: f32[1,128], index: 3, kind: input, shape index: {}]   ;;  %s650_s5 = inlined_call_operand.vmem [shape: f32[1,128], index: 5, kind: input, shape index: {}]   ;;  %s651_s7 = inlined_call_operand.vmem [shape: f32[24,128], index: 7, kind: output, shape index: {1}]   ;;  %s652_s6 = inlined_call_operand.vmem [shape: f32[8,128], index: 6, kind: output, shape index: {0}]  }
   0x1   :  { %v143_v0 = vld [vmem:[%s645_s4 + $0x80] sm:$0xff]  ;;  %v144_v1 = vld [vmem:[%s645_s4 + $0x88] sm:$0xff]  ;;  %352 = vmatprep.subr.bf16.mxu0 %v411_v3  ;;  %349 = vmatprep.mubr.msk.f32.mxu0 %vm412_vm0, %v413_v4  ;;  %v145_v7 = vld [vmem:[%s645_s4 + $0x90] sm:$0xff] }
   0x2   :  { %v127_v2 = vld [vmem:[%s645_s4] sm:$0xff]  ;;  %v376_v5 = vpack.c.bf16 %v144_v1, %v143_v0  ;;  %v128_v6 = vld [vmem:[%s645_s4 + $0x8] sm:$0xff]  ;;  %v146_v8 = vld [vmem:[%s645_s4 + $0x98] sm:$0xff] }
   0x3   :  { %v378_v9 = vpack.c.bf16 %v128_v6, %v127_v2  ;;  %v380_v10 = vpack.c.bf16 %v146_v8, %v145_v7  ;;  %v129_v11 = vld [vmem:[%s645_s4 + $0x10] sm:$0xff]  ;;  %v130_v12 = vld [vmem:[%s645_s4 + $0x18] sm:$0xff]  ;;  %v147_v13 = vld [vmem:[%s645_s4 + $0xa0] sm:$0xff] }
   0x4   :  { %377 = vmatprep.subr.bf16.mxu1 %v376_v5  ;;  %v148_v14 = vld [vmem:[%s645_s4 + $0xa8] sm:$0xff]  ;;  %v26_v15 = vld [vmem:[%s646_s2] sm:$0xff]  ;;  %v382_v17 = vpack.c.bf16 %v130_v12, %v129_v11  ;;  %v28_v22 = vld [vmem:[%s646_s2 + $0x10] sm:$0xff] }
   0x5   :  { %v27_v16 = vld [vmem:[%s646_s2 + $0x8] sm:$0xff]  ;;  %379 = vmatpush3.bf16.msra.mxu1 %v378_v9  ;;  %v131_v19 = vld [vmem:[%s645_s4 + $0x20] sm:$0xff]  ;;  %v384_v20 = vpack.c.bf16 %v148_v14, %v147_v13  ;;  %v29_v23 = vld [vmem:[%s646_s2 + $0x18] sm:$0xff] }
   0x6   :  { %v353_v18 = vpack.c.bf16 %v27_v16, %v26_v15  ;;  %381 = vmatprep.subr.bf16.mxu1 %v380_v10  ;;  %v132_v21 = vld [vmem:[%s645_s4 + $0x28] sm:$0xff]  ;;  %v149_v24 = vld [vmem:[%s645_s4 + $0xb0] sm:$0xff]  ;;  %v150_v25 = vld [vmem:[%s645_s4 + $0xb8] sm:$0xff]  ;;  %v356_v26 = vpack.c.bf16 %v29_v23, %v28_v22 }
   0x7   :  { %v30_v27 = vld [vmem:[%s646_s2 + $0x20] sm:$0xff]  ;;  %v31_v28 = vld [vmem:[%s646_s2 + $0x28] sm:$0xff]  ;;  %v386_v29 = vpack.c.bf16 %v132_v21, %v131_v19  ;;  %v388_v30 = vpack.c.bf16 %v150_v25, %v149_v24  ;;  %v133_v31 = vld [vmem:[%s645_s4 + $0x30] sm:$0xff] }
   0x8   :  { %354 = vmatpush3.bf16.msra.mxu0 %v353_v18  ;;  %v134_v32 = vld [vmem:[%s645_s4 + $0x38] sm:$0xff]  ;;  %v151_v33 = vld [vmem:[%s645_s4 + $0xc0] sm:$0xff]  ;;  %v152_v34 = vld [vmem:[%s645_s4 + $0xc8] sm:$0xff]  ;;  %v359_v35 = vpack.c.bf16 %v31_v28, %v30_v27 }
   0x9   :  { %355 = vmatprep.subr.bf16.mxu0 %v411_v3  ;;  %383 = vmatpush3.bf16.msra.mxu1 %v382_v17  ;;  %v32_v36 = vld [vmem:[%s646_s2 + $0x30] sm:$0xff]  ;;  %v33_v37 = vld [vmem:[%s646_s2 + $0x38] sm:$0xff]  ;;  %v390_v38 = vpack.c.bf16 %v134_v32, %v133_v31  ;;  %v392_v39 = vpack.c.bf16 %v152_v34, %v151_v33  ;;  %v135_v40 = vld [vmem:[%s645_s4 + $0x40] sm:$0xff] }
   0xa   :  { %385 = vmatprep.subr.bf16.mxu1 %v384_v20  ;;  %v136_v41 = vld [vmem:[%s645_s4 + $0x48] sm:$0xff]  ;;  %v153_v42 = vld [vmem:[%s645_s4 + $0xd0] sm:$0xff]  ;;  %v154_v43 = vld [vmem:[%s645_s4 + $0xd8] sm:$0xff]  ;;  %v362_v44 = vpack.c.bf16 %v33_v37, %v32_v36 }
   0xb   :  { %v122_v45 = vld [vmem:[%s647_s1 + $0x8] sm:$0xff]  ;;  %v34_v46 = vld [vmem:[%s646_s2 + $0x40] sm:$0xff]  ;;  %v394_v48 = vpack.c.bf16 %v136_v41, %v135_v40  ;;  %v396_v49 = vpack.c.bf16 %v154_v43, %v153_v42  ;;  %v137_v50 = vld [vmem:[%s645_s4 + $0x50] sm:$0xff] }
   0xc   :  { %357 = vmatpush3.bf16.msra.mxu0 %v356_v26  ;;  %v35_v47 = vld [vmem:[%s646_s2 + $0x48] sm:$0xff]  ;;  %230 = vmatprep.mubr.f32.mxu1 %v122_v45  ;;  %v138_v51 = vld [vmem:[%s645_s4 + $0x58] sm:$0xff]  ;;  %v155_v52 = vld [vmem:[%s645_s4 + $0xe0] sm:$0xff] }
   0xd   :  { %358 = vmatprep.subr.bf16.mxu0 %v411_v3  ;;  %387 = vmatpush3.bf16.msra.mxu1 %v386_v29  ;;  %v156_v53 = vld [vmem:[%s645_s4 + $0xe8] sm:$0xff]  ;;  %v365_v54 = vpack.c.bf16 %v35_v47, %v34_v46  ;;  %v36_v55 = vld [vmem:[%s646_s2 + $0x50] sm:$0xff]  ;;  %v37_v56 = vld [vmem:[%s646_s2 + $0x58] sm:$0xff]  ;;  %v398_v57 = vpack.c.bf16 %v138_v51, %v137_v50 }
   0xe   :  { %389 = vmatprep.subr.bf16.mxu1 %v388_v30  ;;  %v400_v58 = vpack.c.bf16 %v156_v53, %v155_v52  ;;  %v139_v59 = vld [vmem:[%s645_s4 + $0x60] sm:$0xff]  ;;  %v140_v60 = vld [vmem:[%s645_s4 + $0x68] sm:$0xff]  ;;  %v157_v61 = vld [vmem:[%s645_s4 + $0xf0] sm:$0xff]  ;;  %v368_v63 = vpack.c.bf16 %v37_v56, %v36_v55 }
   0xf   :  { %v158_v62 = vld [vmem:[%s645_s4 + $0xf8] sm:$0xff]  ;;  %v38_v0 = vld [vmem:[%s646_s2 + $0x60] sm:$0xff]  ;;  %v39_v1 = vld [vmem:[%s646_s2 + $0x68] sm:$0xff]  ;;  %v402_v2 = vpack.c.bf16 %v140_v60, %v139_v59 }
  0x10   :  { %360 = vmatpush3.bf16.msra.mxu0 %v359_v35  ;;  %v404_v4 = vpack.c.bf16 %v158_v62, %v157_v61  ;;  %v141_v5 = vld [vmem:[%s645_s4 + $0x70] sm:$0xff]  ;;  %v142_v6 = vld [vmem:[%s645_s4 + $0x78] sm:$0xff]  ;;  %v371_v7 = vpack.c.bf16 %v39_v1, %v38_v0  ;;  %v121_v12 = vld [vmem:[%s647_s1] sm:$0xff] }
  0x11   :  { %361 = vmatprep.subr.bf16.mxu0 %v411_v3  ;;  %391 = vmatpush3.bf16.msra.mxu1 %v390_v38  ;;  %v40_v8 = vld [vmem:[%s646_s2 + $0x70] sm:$0xff]  ;;  %v41_v9 = vld [vmem:[%s646_s2 + $0x78] sm:$0xff]  ;;  %v406_v10 = vpack.c.bf16 %v142_v6, %v141_v5  ;;  %v25_v14 = vld [vmem:[%s648_s0] sm:$0xff] }
  0x12   :  { %393 = vmatprep.subr.bf16.mxu1 %v392_v39  ;;  %v374_v11 = vpack.c.bf16 %v41_v9, %v40_v8  ;;  %v124_v13 = vld [vmem:[%s647_s1 + $0x18] sm:$0xff]  ;;  %v126_v15 = vld [vmem:[%s647_s1 + $0x28] sm:$0xff]  ;;  %v125_v16 = vld [vmem:[%s647_s1 + $0x20] sm:$0xff] }
  0x13   :  { %v257_v18 = vld [vmem:[%s649_s3] ss:$0 sm:$0xff] }
  0x14   :  { %363 = vmatpush3.bf16.msra.mxu0 %v362_v44  ;;  %v258_v19 = vld [vmem:[%s650_s5] ss:$0 sm:$0xff] }
  0x15   :  { %364 = vmatprep.subr.bf16.mxu0 %v411_v3  ;;  %395 = vmatpush3.bf16.msra.mxu1 %v394_v48 }
  0x16   :  { %397 = vmatprep.subr.bf16.mxu1 %v396_v49 }
  0x18   :  { %366 = vmatpush3.bf16.msra.mxu0 %v365_v54 }
  0x19   :  { %367 = vmatprep.subr.bf16.mxu0 %v411_v3  ;;  %399 = vmatpush3.bf16.msra.mxu1 %v398_v57 }
  0x1a   :  { %401 = vmatprep.subr.bf16.mxu1 %v400_v58 }
  0x1c   :  { %369 = vmatpush3.bf16.msra.mxu0 %v368_v63 }
  0x1d   :  { %370 = vmatprep.subr.bf16.mxu0 %v411_v3  ;;  %403 = vmatpush3.bf16.msra.mxu1 %v402_v2 }
  0x1e   :  { %405 = vmatprep.subr.bf16.mxu1 %v404_v4 }
  0x20   :  { %372 = vmatpush3.bf16.msra.mxu0 %v371_v7 }
  0x21   :  { %373 = vmatprep.subr.bf16.mxu0 %v411_v3  ;;  %407 = vmatpush3.bf16.msra.mxu1 %v406_v10  ;;  %v123_v3 = vld [vmem:[%s647_s1 + $0x10] sm:$0xff] }
  0x24   :  { %375 = vmatpush3.bf16.msra.mxu0 %v374_v11  ;;  %231 = vmatmul.mubr.f32.vlgmr.msra.gmra.mrb[0].mxu1 %v121_v12 }
  0x25   :  { %235 = vmatprep.mubr.f32.mxu1 %v124_v13 }
  0x27   :  { %350 = vmatmul.mubr.f32.vlgmr.msra.gmra.mrb[0].mxu0 %v25_v14 }
  0x28   :  { %236 = vmatmul.mubr.f32.gmra.mrb[2].mxu1 %v123_v3 }
  0x29   :  { %240 = vmatprep.mubr.f32.mxu1 %v126_v15 }
  0x2c   :  { %241 = vmatmul.mubr.f32.gmra.mrb[4].mxu1 %v125_v16 }
  0xf7   :  { %v308_v17 = vpop.f32.mrb[0].mxu1 }
  0xf8   :  { %v309_v20 = vpop.f32.mrb[1].mxu1 }
  0xf9   :  { %v310_v21 = vadd.f32 %v309_v20, %v308_v17 }
  0xfa   :  { %v115_v22 = vpop.f32.mrb[0].mxu0 }
  0xfb   :  { %v116_v23 = vadd.f32 %v257_v18, %v115_v22  ;;  %v351_v24 = vpop.f32.mrb[1].mxu0  ;;  %v233_v25 = vadd.f32 %v310_v21, %v258_v19  ;;  %v311_v26 = vpop.f32.mrb[2].mxu1 }
  0xfc   :  { %v312_v27 = vpop.f32.mrb[3].mxu1 }
  0xfd   :  { %v119_v28 = vmax.f32 %v116_v23, 0.0  ;;  %246 = vst [vmem:[%s651_s7] sm:$0xff] %v233_v25  ;;  %v313_v29 = vadd.f32 %v312_v27, %v311_v26 }
  0xff   :  { %120 = vst [vmem:[%s652_s6] sm:$0xff] %v119_v28  ;;  %v238_v30 = vadd.f32 %v313_v29, %v258_v19  ;;  %v314_v31 = vpop.f32.mrb[4].mxu1 }
 0x100   :  { %v315_v32 = vpop.f32.mrb[5].mxu1 }
 0x101   :  { %247 = vst [vmem:[%s651_s7 + $0x8] sm:$0xff] %v238_v30  ;;  %v316_v33 = vadd.f32 %v315_v32, %v314_v31 }
 0x103   :  { %v243_v34 = vadd.f32 %v316_v33, %v258_v19 }
 0x105   :  { %248 = vst [vmem:[%s651_s7 + $0x10] sm:$0xff] %v243_v34 }

</bundles_post_ra>
